<compile_context>
chip_gen: v7x
topology: tpu7x:2x2x1
jax: 0.10.0
libtpu: 0.0.40
codegen_flags: <defaults>
</compile_context>

<pallas_src>
import functools

import jax
import jax.numpy as jnp
from jax import lax
from jax.experimental import pallas as pl
from jax.experimental.pallas import tpu as pltpu


def _round_up(x, m):
    return (x + m - 1) // m * m


def _upblock_kernel(x_ref, w_ref, b_ref, skip_ref, out_ref, *, width):
    """One image per grid step; channel-major, packed flat-spatial layout.

    x_ref:    (1, Cin, Pin)     upsampled input flattened row-major with a
                                PACKED pitch `width`, a (width+1)-element zero
                                prefix and a zero suffix (vertical conv halo).
    w_ref:    (9, Cout_p, Cin)  conv taps, t = ky*3 + kx (bf16/f32).
    b_ref:    (Cout_p, 1)       bias, f32.
    skip_ref: (1, Cout_p, Qp)   skip connection, packed flat layout.
    out_ref:  (1, Cout_p, Qp)   output, packed flat layout (lane-dense).
    """
    _, cout_p, qp = out_ref.shape
    span = qp + 2 * width

    # Horizontal conv-halo masks: with a packed row pitch the kx=0 / kx=2 taps
    # wrap to the neighbouring row at the row edges -> zero those lanes.  The
    # mask index is taken mod `width`, which is invariant under the ky*width
    # row offsets below, so the 3 masked kx-columns are shared across all ky.
    col = lax.broadcasted_iota(jnp.int32, (1, span), 1) % width
    zero = jnp.zeros((), x_ref.dtype)
    cols = (
        jnp.where(col == 0, zero, x_ref[0, :, 0:span]),               # kx = 0
        x_ref[0, :, 1:1 + span],                                      # kx = 1
        jnp.where(col == width - 1, zero, x_ref[0, :, 2:2 + span]),   # kx = 2
    )

    # 9 accumulating MXU matmuls (K = Cin each) -> no im2col slab in VMEM.
    acc = jnp.zeros((cout_p, qp), jnp.float32)
    for ky in range(3):
        off = ky * width
        for kx in range(3):
            acc += jnp.dot(w_ref[ky * 3 + kx], cols[kx][:, off:off + qp],
                           preferred_element_type=jnp.float32)

    # Fused f32 epilogue (v5e-safe): bias + skip + SiLU, lane-dense store.
    z = acc + b_ref[...] + skip_ref[0].astype(jnp.float32)
    out_ref[0] = (z * jax.nn.sigmoid(z)).astype(out_ref.dtype)


def upblock_forward(x, skip, weight, bias, out_shape, *,
                    matmul_dtype=jnp.bfloat16):
    """UpBlock forward.

    x:      (N, Cin, Hin, Win)    NCHW (like the PyTorch module)
    skip:   (N, Cout, Hout, Wout) NCHW
    weight: (Cout, Cin, 3, 3)     PyTorch Conv2d weight layout
    bias:   (Cout,)
    out_shape: (Hout, Wout) == conv_dims_out_shape
    matmul_dtype: MXU operand dtype (default bf16; accumulation + epilogue f32)
    returns (N, Cout, Hout, Wout) NCHW, dtype of x
    """
    N, Cin, Hin, Win = x.shape
    Cout = weight.shape[0]
    H, W = out_shape
    HW = H * W

    if matmul_dtype is None:
        matmul_dtype = x.dtype

    Cout_p = _round_up(Cout, 8)            # full-sublane vregs / MXU rows
    Qp = _round_up(HW, 128)                # lane-dense output extent
    Pin = _round_up(Qp + 2 * W + 2, 128)   # slab extent (all tap views fit)

    # ---- nearest upsample WITHOUT a gather (integral scale: reshape+broadcast).
    if H % Hin == 0 and W % Win == 0:
        rh, rw = H // Hin, W // Win
        x_up = jnp.broadcast_to(
            x.reshape(N, Cin, Hin, 1, Win, 1), (N, Cin, Hin, rh, Win, rw)
        ).reshape(N, Cin, HW)
    else:
        # TODO(synk): non-integral nearest scale falls back to a wrapper gather
        # (PyTorch legacy mode='nearest' floor rule).
        ih = (jnp.arange(H) * Hin) // H
        iw = (jnp.arange(W) * Win) // W
        x_up = x[:, :, ih][:, :, :, iw].reshape(N, Cin, HW)

    # Packed-pitch slab: (W+1)-element zero prefix + data + zero suffix; XLA
    # fuses broadcast+pad+cast into a single slab write (no extra HBM passes).
    x_slab = jnp.pad(x_up, ((0, 0), (0, 0), (W + 1, Pin - (W + 1) - HW)))
    x_slab = x_slab.astype(matmul_dtype)

    # Skip: free reshape; zero-pad channels/lanes only when quanta require it.
    skip_p = jnp.pad(skip.reshape(N, Cout, HW),
                     ((0, 0), (0, Cout_p - Cout), (0, Qp - HW)))

    # Conv weight as (9, Cout_p, Cin) taps (t = ky*3+kx); bias (Cout_p, 1) f32.
    w9 = jnp.transpose(weight, (2, 3, 0, 1)).reshape(9, Cout, Cin)
    w9 = jnp.pad(w9, ((0, 0), (0, Cout_p - Cout), (0, 0))).astype(matmul_dtype)
    b2 = jnp.pad(bias, (0, Cout_p - Cout)).reshape(Cout_p, 1).astype(jnp.float32)

    out_flat = pl.pallas_call(
        functools.partial(_upblock_kernel, width=W),
        out_shape=jax.ShapeDtypeStruct((N, Cout_p, Qp), x.dtype),
        grid_spec=pltpu.PrefetchScalarGridSpec(
            num_scalar_prefetch=0,
            grid=(N,),
            in_specs=[
                pl.BlockSpec((1, Cin, Pin), lambda n: (n, 0, 0)),
                pl.BlockSpec((9, Cout_p, Cin), lambda n: (0, 0, 0)),  # resident
                pl.BlockSpec((Cout_p, 1), lambda n: (0, 0)),          # resident
                pl.BlockSpec((1, Cout_p, Qp), lambda n: (n, 0, 0)),
            ],
            out_specs=pl.BlockSpec((1, Cout_p, Qp), lambda n: (n, 0, 0)),
        ),
        compiler_params=pltpu.CompilerParams(
            dimension_semantics=("parallel",),
            # Leaves headroom under v7x's 64 MiB physical VMEM; well within
            # v5e/v6e's 128 MiB.
            vmem_limit_bytes=48 * 1024 * 1024,
        ),
    )(x_slab, w9, b2, skip_p)

    # Packed layout => this is the NCHW output; slice is a no-op when no
    # channel/lane padding was required.
    return out_flat[:, :Cout, :HW].reshape(N, Cout, H, W)


def upblock_reference(x, skip, weight, bias, out_shape):
    """Pure-JAX reference matching the PyTorch UpBlock.forward."""
    N, Cin, Hin, Win = x.shape
    Hout, Wout = out_shape
    hi = (jnp.arange(Hout) * Hin) // Hout
    wi = (jnp.arange(Wout) * Win) // Wout
    x_up = x[:, :, hi][:, :, :, wi]
    y = lax.conv_general_dilated(
        x_up, weight, window_strides=(1, 1), padding=((1, 1), (1, 1)),
        dimension_numbers=("NCHW", "OIHW", "NCHW"),
    ) + bias[None, :, None, None]
    z = y + skip
    return z * jax.nn.sigmoid(z)


if __name__ == "__main__":
    # Small shapes consistent with the module: upsample 8x8 -> 16x16.
    N, Cin, Cout = 2, 4, 4
    Hin, Win = 8, 8
    out_shape = (16, 16)

    key = jax.random.PRNGKey(0)
    kx_, ks_, kw_, kb_ = jax.random.split(key, 4)
    x = jax.random.normal(kx_, (N, Cin, Hin, Win), dtype=jnp.float32)
    skip = jax.random.normal(ks_, (N, Cout, *out_shape), dtype=jnp.float32)

    # Deterministic params (PyTorch Conv2d default init: U(-b, b), b=1/sqrt(fan_in)).
    fan_in = Cin * 3 * 3
    bound = 1.0 / (fan_in ** 0.5)
    weight = jax.random.uniform(kw_, (Cout, Cin, 3, 3), jnp.float32, -bound, bound)
    bias = jax.random.uniform(kb_, (Cout,), jnp.float32, -bound, bound)

    ref = upblock_reference(x, skip, weight, bias, out_shape)

    # f32 MXU operands: tight check of the algorithm.
    fwd_f32 = jax.jit(functools.partial(upblock_forward, out_shape=out_shape,
                                        matmul_dtype=jnp.float32))
    out_f32 = fwd_f32(x, skip, weight, bias)
    jax.block_until_ready(out_f32)
    assert out_f32.shape == (N, Cout, *out_shape)
    assert jnp.allclose(out_f32, ref, atol=1e-4, rtol=1e-4), "f32 mismatch vs reference"

    # bf16 MXU operands (default fast path): tolerance gated on dtype.
    fwd = jax.jit(functools.partial(upblock_forward, out_shape=out_shape))
    out = fwd(x, skip, weight, bias)
    jax.block_until_ready(out)
    assert out.shape == (N, Cout, *out_shape)
    assert jnp.allclose(out, ref, atol=5e-2, rtol=5e-2), "bf16 mismatch vs reference"

    print("KERNEL_OK")
</pallas_src>

<mosaic_0001>
module attributes {stable_mosaic.version = 11 : i64} {
  func.func @_upblock_kernel(%arg0: i32, %arg1: memref<1x4x384xf32, #tpu.memory_space<vmem>>, %arg2: memref<9x8x4xf32, #tpu.memory_space<vmem>>, %arg3: memref<8x1xf32, #tpu.memory_space<vmem>>, %arg4: memref<1x8x256xf32, #tpu.memory_space<vmem>>, %arg5: memref<1x8x256xf32, #tpu.memory_space<vmem>>) attributes {dimension_semantics = [#tpu.dimension_semantics<parallel>], iteration_bounds = array<i64: 2>, scalar_prefetch = 0 : i64, scratch_operands = 0 : i64, tpu.core_type = #tpu.core_type<tc>, window_params = [{transform_indices = @transform_0, window_bounds = array<i64: 1, 4, 384>}, {pipeline_mode = #tpu.pipeline_mode<synchronous>, transform_indices = @transform_1, window_bounds = array<i64: 9, 8, 4>}, {pipeline_mode = #tpu.pipeline_mode<synchronous>, transform_indices = @transform_2, window_bounds = array<i64: 8, 1>}, {transform_indices = @transform_3, window_bounds = array<i64: 1, 8, 256>}, {transform_indices = @transform_4, window_bounds = array<i64: 1, 8, 256>}]} {
    %0 = tpu.iota {dimensions = array<i32: 1>} : vector<1x288xi32>
    %c16_i32 = arith.constant 16 : i32
    %c0_i32 = arith.constant 0 : i32
    %1 = arith.cmpi eq, %c16_i32, %c0_i32 : i32
    %c1_i32 = arith.constant 1 : i32
    %2 = arith.select %1, %c1_i32, %c16_i32 : i32
    %3 = vector.broadcast %2 : i32 to vector<1x288xi32>
    %4 = arith.remsi %0, %3 : vector<1x288xi32>
    %c0_i32_0 = arith.constant 0 : i32
    %5 = vector.broadcast %c0_i32_0 : i32 to vector<1x288xi32>
    %6 = arith.cmpi ne, %4, %5 : vector<1x288xi32>
    %c0_i32_1 = arith.constant 0 : i32
    %7 = vector.broadcast %c0_i32_1 : i32 to vector<1x288xi32>
    %8 = arith.cmpi slt, %4, %7 : vector<1x288xi32>
    %c0_i32_2 = arith.constant 0 : i32
    %9 = arith.cmpi slt, %2, %c0_i32_2 : i32
    %10 = vector.broadcast %9 : i1 to vector<1x288xi1>
    %11 = vector.broadcast %10 : vector<1x288xi1> to vector<1x288xi1>
    %12 = arith.xori %8, %11 : vector<1x288xi1>
    %13 = arith.andi %12, %6 : vector<1x288xi1>
    %14 = vector.broadcast %2 : i32 to vector<1x288xi32>
    %15 = arith.addi %4, %14 : vector<1x288xi32>
    %16 = arith.select %13, %15, %4 : vector<1x288xi1>, vector<1x288xi32>
    %c0_i32_3 = arith.constant 0 : i32
    %17 = vector.broadcast %c0_i32_3 : i32 to vector<1x288xi32>
    %18 = arith.cmpi eq, %16, %17 : vector<1x288xi32>
    %c0 = arith.constant 0 : index
    %c0_4 = arith.constant 0 : index
    %c0_5 = arith.constant 0 : index
    %19 = vector.load %arg1[%c0, %c0_4, %c0_5] : memref<1x4x384xf32, #tpu.memory_space<vmem>>, vector<1x4x288xf32>
    %20 = vector.shape_cast %19 : vector<1x4x288xf32> to vector<4x288xf32>
    %cst = arith.constant 0.000000e+00 : f32
    %21 = vector.shape_cast %18 : vector<1x288xi1> to vector<1x288xi1>
    %22 = vector.broadcast %21 : vector<1x288xi1> to vector<4x288xi1>
    %23 = vector.broadcast %cst : f32 to vector<4x288xf32>
    %24 = arith.select %22, %23, %20 : vector<4x288xi1>, vector<4x288xf32>
    %c0_6 = arith.constant 0 : index
    %c0_7 = arith.constant 0 : index
    %c1 = arith.constant 1 : index
    %25 = vector.load %arg1[%c0_6, %c0_7, %c1] : memref<1x4x384xf32, #tpu.memory_space<vmem>>, vector<1x4x288xf32>
    %26 = vector.shape_cast %25 : vector<1x4x288xf32> to vector<4x288xf32>
    %c15_i32 = arith.constant 15 : i32
    %27 = vector.broadcast %c15_i32 : i32 to vector<1x288xi32>
    %28 = arith.cmpi eq, %16, %27 : vector<1x288xi32>
    %c0_8 = arith.constant 0 : index
    %c0_9 = arith.constant 0 : index
    %c2 = arith.constant 2 : index
    %29 = vector.load %arg1[%c0_8, %c0_9, %c2] : memref<1x4x384xf32, #tpu.memory_space<vmem>>, vector<1x4x288xf32>
    %30 = vector.shape_cast %29 : vector<1x4x288xf32> to vector<4x288xf32>
    %cst_10 = arith.constant 0.000000e+00 : f32
    %31 = vector.shape_cast %28 : vector<1x288xi1> to vector<1x288xi1>
    %32 = vector.broadcast %31 : vector<1x288xi1> to vector<4x288xi1>
    %33 = vector.broadcast %cst_10 : f32 to vector<4x288xf32>
    %34 = arith.select %32, %33, %30 : vector<4x288xi1>, vector<4x288xf32>
    %cst_11 = arith.constant 0.000000e+00 : f32
    %35 = vector.broadcast %cst_11 : f32 to vector<8x256xf32>
    %c0_12 = arith.constant 0 : index
    %c0_13 = arith.constant 0 : index
    %c0_14 = arith.constant 0 : index
    %36 = vector.load %arg2[%c0_12, %c0_13, %c0_14] : memref<9x8x4xf32, #tpu.memory_space<vmem>>, vector<1x8x4xf32>
    %37 = vector.shape_cast %36 : vector<1x8x4xf32> to vector<8x4xf32>
    %38 = vector.extract_strided_slice %24 {offsets = [0, 0], sizes = [4, 256], strides = [1, 1]} : vector<4x288xf32> to vector<4x256xf32>
    %cst_15 = arith.constant dense<0.000000e+00> : vector<8x256xf32>
    %39 = tpu.matmul %37, %38, %cst_15 {dimension_numbers = #tpu.dot_dimension_numbers<[1], [0], [0], [1], [0, 0, 1, 1], [], []>} : vector<8x4xf32>, vector<4x256xf32>, vector<8x256xf32> -> vector<8x256xf32>
    %40 = arith.addf %35, %39 : vector<8x256xf32>
    %c1_16 = arith.constant 1 : index
    %c0_17 = arith.constant 0 : index
    %c0_18 = arith.constant 0 : index
    %41 = vector.load %arg2[%c1_16, %c0_17, %c0_18] : memref<9x8x4xf32, #tpu.memory_space<vmem>>, vector<1x8x4xf32>
    %42 = vector.shape_cast %41 : vector<1x8x4xf32> to vector<8x4xf32>
    %43 = vector.extract_strided_slice %26 {offsets = [0, 0], sizes = [4, 256], strides = [1, 1]} : vector<4x288xf32> to vector<4x256xf32>
    %cst_19 = arith.constant dense<0.000000e+00> : vector<8x256xf32>
    %44 = tpu.matmul %42, %43, %cst_19 {dimension_numbers = #tpu.dot_dimension_numbers<[1], [0], [0], [1], [0, 0, 1, 1], [], []>} : vector<8x4xf32>, vector<4x256xf32>, vector<8x256xf32> -> vector<8x256xf32>
    %45 = arith.addf %40, %44 : vector<8x256xf32>
    %c2_20 = arith.constant 2 : index
    %c0_21 = arith.constant 0 : index
    %c0_22 = arith.constant 0 : index
    %46 = vector.load %arg2[%c2_20, %c0_21, %c0_22] : memref<9x8x4xf32, #tpu.memory_space<vmem>>, vector<1x8x4xf32>
    %47 = vector.shape_cast %46 : vector<1x8x4xf32> to vector<8x4xf32>
    %48 = vector.extract_strided_slice %34 {offsets = [0, 0], sizes = [4, 256], strides = [1, 1]} : vector<4x288xf32> to vector<4x256xf32>
    %cst_23 = arith.constant dense<0.000000e+00> : vector<8x256xf32>
    %49 = tpu.matmul %47, %48, %cst_23 {dimension_numbers = #tpu.dot_dimension_numbers<[1], [0], [0], [1], [0, 0, 1, 1], [], []>} : vector<8x4xf32>, vector<4x256xf32>, vector<8x256xf32> -> vector<8x256xf32>
    %50 = arith.addf %45, %49 : vector<8x256xf32>
    %c3 = arith.constant 3 : index
    %c0_24 = arith.constant 0 : index
    %c0_25 = arith.constant 0 : index
    %51 = vector.load %arg2[%c3, %c0_24, %c0_25] : memref<9x8x4xf32, #tpu.memory_space<vmem>>, vector<1x8x4xf32>
    %52 = vector.shape_cast %51 : vector<1x8x4xf32> to vector<8x4xf32>
    %53 = vector.extract_strided_slice %24 {offsets = [0, 16], sizes = [4, 256], strides = [1, 1]} : vector<4x288xf32> to vector<4x256xf32>
    %cst_26 = arith.constant dense<0.000000e+00> : vector<8x256xf32>
    %54 = tpu.matmul %52, %53, %cst_26 {dimension_numbers = #tpu.dot_dimension_numbers<[1], [0], [0], [1], [0, 0, 1, 1], [], []>} : vector<8x4xf32>, vector<4x256xf32>, vector<8x256xf32> -> vector<8x256xf32>
    %55 = arith.addf %50, %54 : vector<8x256xf32>
    %c4 = arith.constant 4 : index
    %c0_27 = arith.constant 0 : index
    %c0_28 = arith.constant 0 : index
    %56 = vector.load %arg2[%c4, %c0_27, %c0_28] : memref<9x8x4xf32, #tpu.memory_space<vmem>>, vector<1x8x4xf32>
    %57 = vector.shape_cast %56 : vector<1x8x4xf32> to vector<8x4xf32>
    %58 = vector.extract_strided_slice %26 {offsets = [0, 16], sizes = [4, 256], strides = [1, 1]} : vector<4x288xf32> to vector<4x256xf32>
    %cst_29 = arith.constant dense<0.000000e+00> : vector<8x256xf32>
    %59 = tpu.matmul %57, %58, %cst_29 {dimension_numbers = #tpu.dot_dimension_numbers<[1], [0], [0], [1], [0, 0, 1, 1], [], []>} : vector<8x4xf32>, vector<4x256xf32>, vector<8x256xf32> -> vector<8x256xf32>
    %60 = arith.addf %55, %59 : vector<8x256xf32>
    %c5 = arith.constant 5 : index
    %c0_30 = arith.constant 0 : index
    %c0_31 = arith.constant 0 : index
    %61 = vector.load %arg2[%c5, %c0_30, %c0_31] : memref<9x8x4xf32, #tpu.memory_space<vmem>>, vector<1x8x4xf32>
    %62 = vector.shape_cast %61 : vector<1x8x4xf32> to vector<8x4xf32>
    %63 = vector.extract_strided_slice %34 {offsets = [0, 16], sizes = [4, 256], strides = [1, 1]} : vector<4x288xf32> to vector<4x256xf32>
    %cst_32 = arith.constant dense<0.000000e+00> : vector<8x256xf32>
    %64 = tpu.matmul %62, %63, %cst_32 {dimension_numbers = #tpu.dot_dimension_numbers<[1], [0], [0], [1], [0, 0, 1, 1], [], []>} : vector<8x4xf32>, vector<4x256xf32>, vector<8x256xf32> -> vector<8x256xf32>
    %65 = arith.addf %60, %64 : vector<8x256xf32>
    %c6 = arith.constant 6 : index
    %c0_33 = arith.constant 0 : index
    %c0_34 = arith.constant 0 : index
    %66 = vector.load %arg2[%c6, %c0_33, %c0_34] : memref<9x8x4xf32, #tpu.memory_space<vmem>>, vector<1x8x4xf32>
    %67 = vector.shape_cast %66 : vector<1x8x4xf32> to vector<8x4xf32>
    %68 = vector.extract_strided_slice %24 {offsets = [0, 32], sizes = [4, 256], strides = [1, 1]} : vector<4x288xf32> to vector<4x256xf32>
    %cst_35 = arith.constant dense<0.000000e+00> : vector<8x256xf32>
    %69 = tpu.matmul %67, %68, %cst_35 {dimension_numbers = #tpu.dot_dimension_numbers<[1], [0], [0], [1], [0, 0, 1, 1], [], []>} : vector<8x4xf32>, vector<4x256xf32>, vector<8x256xf32> -> vector<8x256xf32>
    %70 = arith.addf %65, %69 : vector<8x256xf32>
    %c7 = arith.constant 7 : index
    %c0_36 = arith.constant 0 : index
    %c0_37 = arith.constant 0 : index
    %71 = vector.load %arg2[%c7, %c0_36, %c0_37] : memref<9x8x4xf32, #tpu.memory_space<vmem>>, vector<1x8x4xf32>
    %72 = vector.shape_cast %71 : vector<1x8x4xf32> to vector<8x4xf32>
    %73 = vector.extract_strided_slice %26 {offsets = [0, 32], sizes = [4, 256], strides = [1, 1]} : vector<4x288xf32> to vector<4x256xf32>
    %cst_38 = arith.constant dense<0.000000e+00> : vector<8x256xf32>
    %74 = tpu.matmul %72, %73, %cst_38 {dimension_numbers = #tpu.dot_dimension_numbers<[1], [0], [0], [1], [0, 0, 1, 1], [], []>} : vector<8x4xf32>, vector<4x256xf32>, vector<8x256xf32> -> vector<8x256xf32>
    %75 = arith.addf %70, %74 : vector<8x256xf32>
    %c8 = arith.constant 8 : index
    %c0_39 = arith.constant 0 : index
    %c0_40 = arith.constant 0 : index
    %76 = vector.load %arg2[%c8, %c0_39, %c0_40] : memref<9x8x4xf32, #tpu.memory_space<vmem>>, vector<1x8x4xf32>
    %77 = vector.shape_cast %76 : vector<1x8x4xf32> to vector<8x4xf32>
    %78 = vector.extract_strided_slice %34 {offsets = [0, 32], sizes = [4, 256], strides = [1, 1]} : vector<4x288xf32> to vector<4x256xf32>
    %cst_41 = arith.constant dense<0.000000e+00> : vector<8x256xf32>
    %79 = tpu.matmul %77, %78, %cst_41 {dimension_numbers = #tpu.dot_dimension_numbers<[1], [0], [0], [1], [0, 0, 1, 1], [], []>} : vector<8x4xf32>, vector<4x256xf32>, vector<8x256xf32> -> vector<8x256xf32>
    %80 = arith.addf %75, %79 : vector<8x256xf32>
    %c0_42 = arith.constant 0 : index
    %c0_43 = arith.constant 0 : index
    %81 = vector.load %arg3[%c0_42, %c0_43] : memref<8x1xf32, #tpu.memory_space<vmem>>, vector<8x1xf32>
    %82 = vector.broadcast %81 : vector<8x1xf32> to vector<8x256xf32>
    %83 = arith.addf %80, %82 : vector<8x256xf32>
    %c0_44 = arith.constant 0 : index
    %c0_45 = arith.constant 0 : index
    %c0_46 = arith.constant 0 : index
    %84 = vector.load %arg4[%c0_44, %c0_45, %c0_46] : memref<1x8x256xf32, #tpu.memory_space<vmem>>, vector<1x8x256xf32>
    %85 = vector.shape_cast %84 : vector<1x8x256xf32> to vector<8x256xf32>
    %86 = arith.addf %83, %85 : vector<8x256xf32>
    %87 = arith.negf %86 : vector<8x256xf32>
    %88 = math.exp %87 : vector<8x256xf32>
    %cst_47 = arith.constant 1.000000e+00 : f32
    %89 = vector.broadcast %cst_47 : f32 to vector<8x256xf32>
    %90 = arith.addf %89, %88 : vector<8x256xf32>
    %91 = arith.divf %89, %90 : vector<8x256xf32>
    %92 = arith.mulf %86, %91 : vector<8x256xf32>
    %c0_48 = arith.constant 0 : index
    %c0_49 = arith.constant 0 : index
    %c0_50 = arith.constant 0 : index
    %93 = vector.load %arg5[%c0_48, %c0_49, %c0_50] : memref<1x8x256xf32, #tpu.memory_space<vmem>>, vector<1x8x256xf32>
    %94 = vector.shape_cast %93 : vector<1x8x256xf32> to vector<8x256xf32>
    %95 = vector.shape_cast %92 : vector<8x256xf32> to vector<1x8x256xf32>
    tpu.vector_store %arg5[%c0_48, %c0_49, %c0_50], %95 {strides = array<i32>} : memref<1x8x256xf32, #tpu.memory_space<vmem>>, vector<1x8x256xf32>,
    return
  }
  func.func @transform_0(%arg0: i32) -> (i32, i32, i32) {
    %c0_i32 = arith.constant 0 : i32
    %c0_i32_0 = arith.constant 0 : i32
    %c0_i32_1 = arith.constant 0 : i32
    return %arg0, %c0_i32, %c0_i32_0 : i32, i32, i32
  }
  func.func @transform_1(%arg0: i32) -> (i32, i32, i32) {
    %c0_i32 = arith.constant 0 : i32
    %c0_i32_0 = arith.constant 0 : i32
    %c0_i32_1 = arith.constant 0 : i32
    %c0_i32_2 = arith.constant 0 : i32
    return %c0_i32, %c0_i32_0, %c0_i32_1 : i32, i32, i32
  }
  func.func @transform_2(%arg0: i32) -> (i32, i32) {
    %c0_i32 = arith.constant 0 : i32
    %c0_i32_0 = arith.constant 0 : i32
    %c0_i32_1 = arith.constant 0 : i32
    return %c0_i32, %c0_i32_0 : i32, i32
  }
  func.func @transform_3(%arg0: i32) -> (i32, i32, i32) {
    %c0_i32 = arith.constant 0 : i32
    %c0_i32_0 = arith.constant 0 : i32
    %c0_i32_1 = arith.constant 0 : i32
    return %arg0, %c0_i32, %c0_i32_0 : i32, i32, i32
  }
  func.func @transform_4(%arg0: i32) -> (i32, i32, i32) {
    %c0_i32 = arith.constant 0 : i32
    %c0_i32_0 = arith.constant 0 : i32
    %c0_i32_1 = arith.constant 0 : i32
    return %arg0, %c0_i32, %c0_i32_0 : i32, i32, i32
  }
}

</mosaic_0001>

<bundles_post_ra>
// kernel: upblock_forward.1
= control target key start
LH: loop header
LB: loop body
LE: loop exit
PB: predicated region body
PF: predicated region fallthrough
CT: control target
= control target key end

     0   :  { %s1332_s15 = smov 0   ;;  %s1474_s0 = inlined_call_operand.vmem [shape: f32[2,4,384], index: 0, kind: input, shape index: {}]   ;;  %s1475_s1 = inlined_call_operand.vmem [shape: f32[9,8,4], index: 1, kind: input, shape index: {}]   ;;  %s1476_s2 = inlined_call_operand.vmem [shape: f32[8,1], index: 2, kind: input, shape index: {}]   ;;  %s1477_s3 = inlined_call_operand.vmem [shape: f32[2,8,256], index: 3, kind: input, shape index: {}]   ;;  %s1478_s4 = inlined_call_operand.vmem [shape: f32[2,8,256], index: 4, kind: output, shape index: {}]  }
   0x1 LB: > { %s1197_s16 = sadd.s32 4294967295, %s1297_s15   ;;  %p1201_p0 = scmp.ge.s32.totalorder %s1297_s15, 1  ;;  %s1297_s15 = sphi %s1332_s15, %s14_s15  }
   0x2   : > { %p172_p1 = scmp.lt.s32.totalorder %s1297_s15, 3 }
   0x4   : > { %p173_p2 = pnand %p1201_p0, %p172_p1 }
   0x5   : > { %p203_p3 = scmp.lt.s32.totalorder (!%p173_p2), %s1197_s16, 1  ;;  %s1299_s21 = smov (!%p173_p2), 126   ;;  %v1302_v3 = vmov (!%p173_p2), 0.0   ;;  %v218_v4 = vlaneseq (!%p173_p2)  ;;  %vm291_vm1 = vcmask (!%p173_p2), 1031168   ;;  %vm656_vm3 = vcmask (!%p173_p2), 908288   ;;  %v1222_v24 = vld [vmem:[%s1475_s1 + $0x20] sm:$0xff] (!%p173_p2) }
   0x6   : > { %176 = sbr.rel (%p173_p2) target bundleno = 534 (0x216), region = 36  ;;  %s1300_s22 = smov (!%p173_p2), 111   ;;  %730 = vmatprep.mubr.f32.mxu0 (!%p173_p2), %v1302_v3  ;;  %385 = vmatprep.mubr.f32.mxu1 (!%p173_p2), %v1302_v3  ;;  %vm316_vm5 = vcmask (!%p173_p2), 1043456   ;;  %vm312_vm8 = vcmask (!%p173_p2), 31744   ;;  %vm309_vm9 = vcmask (!%p173_p2), 1039360   ;;  %v1306_v31 = vmov (!%p173_p2), 0  }
   0x7   : > { %s1301_s23 = smov (!%p173_p2), 127   ;;  %v219_v5 = vand.u32 (!%p173_p2), 127, %v218_v4  ;;  %s1303_s24 = smov (!%p173_p2), 112   ;;  %1281 = vset.pattern.permute.xlu0 (!%p173_p2), %v1306_v31  ;;  %v1102_v32 = vld [vmem:[%s1476_s2] sm:$0xff] (!%p173_p2)  ;;  %vm565_vm11 = vcmask (!%p173_p2), 916480   ;;  %v1226_v37 = vld [vmem:[%s1475_s1 + $0x28] sm:$0xff] (!%p173_p2) }
   0x8   : > { %s1304_s27 = smov (!%p173_p2), 96   ;;  %s1305_s28 = smov (!%p173_p2), 95   ;;  %v1207_v40 = vld [vmem:[%s1475_s1 + $0x8] sm:$0xff] (!%p173_p2)  ;;  %vm838_vm12 = vcmask (!%p173_p2), 785408   ;;  %v300_v47 = vld [vmem:[%s1475_s1] sm:$0xff] (!%p173_p2)  ;;  %v1230_v48 = vld [vmem:[%s1475_s1 + $0x30] sm:$0xff] (!%p173_p2) }
   0x9   : > { %v221_v6 = vadd.s32 (!%p173_p2), 256, %v219_v5  ;;  %v220_v7 = vadd.s32 (!%p173_p2), 128, %v219_v5  ;;  %v226_v12 = vand.u32 (!%p173_p2), 15, %v219_v5  ;;  %vm929_vm13 = vcmask (!%p173_p2), 777216   ;;  %v1214_v56 = vld [vmem:[%s1475_s1 + $0x10] sm:$0xff] (!%p173_p2)  ;;  %v1234_v57 = vld [vmem:[%s1475_s1 + $0x38] sm:$0xff] (!%p173_p2) }
   0xb   : > { %v240_v9 = vand.u32 (!%p173_p2), 15, %v221_v6  ;;  %v233_v10 = vand.u32 (!%p173_p2), 15, %v220_v7  ;;  %vm275_vm4 = vcmp.eq.s32.totalorder (!%p173_p2), %v226_v12, 15  ;;  %vm258_vm10 = vcmp.eq.s32.totalorder (!%p173_p2), %v226_v12, 0 }
   0xd   : > { %s1480_s16 = smov (!%p203_p3, %s1197_s16), 1  ;;  %vm277_vm0 = vcmp.eq.s32.totalorder %v240_v9, 15  ;;  %vm276_vm2 = vcmp.eq.s32.totalorder %v233_v10, 15  ;;  %vm260_vm6 = vcmp.eq.s32.totalorder %v240_v9, 0  ;;  %vm259_vm7 = vcmp.eq.s32.totalorder %v233_v10, 0 }
   0xe   : > { %s1264_s17 = smul.u32 12, %s1480_s16 }
  0x10   : > { %s207_s20 = scalar_lea.vmem %s1474_s0, %s1264_s17 }
  0x11   : > { %v1346_v0 = vld [vmem:[%s207_s20] sm:$0xff]  ;;  %v1354_v2 = vld [vmem:[%s207_s20 + $0x8] sm:$0xf] }
  0x12   : > { %285 = vrot.lane.b32.xlu1 %v1346_v0, %s1299_s21  ;;  %v1351_v1 = vcombine.high %v1346_v0, %v1346_v0  ;;  %v274_v26 = vsel %vm260_vm6, 0.0, %v1354_v2  ;;  %v272_v30 = vsel %vm258_vm10, 0.0, %v1346_v0 }
  0x14   : > { %287 = vrot.lane.b32.xlu0 %v1351_v1, %s1299_s21  ;;  %v273_v27 = vsel %vm259_vm7, 0.0, %v1351_v1 }
  0x16   : > { %650 = vrot.lane.b32.xlu1 %v1346_v0, %s1300_s22 }
  0x18   : > { %289 = vrot.lane.b32.xlu0 %v1354_v2, %s1299_s21 }
  0x1a   : > { %652 = vrot.lane.b32.xlu1 %v1351_v1, %s1300_s22 }
  0x1c   : > { %654 = vrot.lane.b32.xlu0 %v1354_v2, %s1300_s22 }
  0x1e   : > { %307 = vrot.lane.b32.xlu1 %v1354_v2, %s1301_s23 }
  0x20   : > { %305 = vrot.lane.b32.xlu0 %v1351_v1, %s1301_s23 }
  0x84   : > { %v286_v8 = vpop.permute.xlu1 %285 }
  0x86   : > { %v288_v11 = vpop.permute.xlu0 %287 }
  0x87   : > { %v292_v17 = vsel %vm291_vm1, %v286_v8, %v288_v11 }
  0x88   : > { %v651_v13 = vpop.permute.xlu1 %650  ;;  %v1371_v22 = vsel %vm275_vm4, 0.0, %v292_v17 }
  0x8a   : > { %v290_v14 = vpop.permute.xlu0 %289 }
  0x8b   : > { %v293_v15 = vsel %vm291_vm1, %v288_v11, %v290_v14  ;;  %v299_v16 = vsel %vm277_vm0, 0.0, %v290_v14 }
  0x8c   : > { %746 = vrot.lane.b32.xlu1 %v299_v16, %s1303_s24  ;;  %v1367_v18 = vsel %vm276_vm2, 0.0, %v293_v15  ;;  %v653_v19 = vpop.permute.xlu1 %652 }
  0x8d   : > { %744 = vrot.lane.b32.xlu0 %v1367_v18, %s1303_s24  ;;  %v657_v21 = vsel %vm656_vm3, %v651_v13, %v653_v19 }
  0x8e   : > { %v655_v20 = vpop.permute.xlu0 %654 }
  0x8f   : > { %v658_v23 = vsel %vm656_vm3, %v653_v19, %v655_v20 }
  0x90   : > { %742 = vrot.lane.b32.xlu1 %v1371_v22, %s1303_s24  ;;  %1223 = vmatprep.subr.msk.mxu0 %vm316_vm5, %v658_v23  ;;  %v308_v25 = vpop.permute.xlu1 %307 }
  0x91   : > { %303 = vrot.lane.b32.xlu0 %v1346_v0, %s1301_s23  ;;  %1224 = vmatpush1.msk.msra.mxu0 %vm316_vm5, %v657_v21  ;;  %s1246_s23 = sshll.u32 %s1480_s16, 4 }
  0x92   : > { %v306_v28 = vpop.permute.xlu0 %305  ;;  %1225 = vmatmul.mubr.msk.f32.vlgmr.msra.gmra.mrb[0].mxu0 %vm312_vm8, %v1222_v24  ;;  %s212_s26 = scalar_lea.vmem %s1477_s3, %s1246_s23 }
  0x93   : > { %v311_v29 = vsel %vm309_vm9, %v306_v28, %v308_v25  ;;  %821 = vmatprep.mubr.f32.mxu0 %v1302_v3  ;;  %v1110_v11 = vld [vmem:[%s212_s26] sm:$0xff]  ;;  %v1111_v12 = vld [vmem:[%s212_s26 + $0x8] sm:$0xff] }
  0x94   : > { %836 = vrot.lane.b32.xlu1 %v274_v26, %s1304_s27  ;;  %1208 = vmatprep.subr.msk.mxu1 %vm316_vm5, %v311_v29 }
  0x95   : > { %834 = vrot.lane.b32.xlu0 %v273_v27, %s1304_s27 }
  0x98   : > { %925 = vrot.lane.b32.xlu1 %v1351_v1, %s1305_s28  ;;  %v1218_v1 = vld [vmem:[%s1475_s1 + $0x18] sm:$0xff] }
  0x99   : > { %832 = vrot.lane.b32.xlu0 %v272_v30, %s1304_s27 }
  0x9c   : > { %923 = vrot.lane.b32.xlu1 %v1346_v0, %s1305_s28 }
  0x9d   : > { %927 = vrot.lane.b32.xlu0 %v1354_v2, %s1305_s28  ;;  %v1238_v2 = vld [vmem:[%s1475_s1 + $0x40] sm:$0xff]  ;;  %s217_s28 = scalar_lea.vmem %s1478_s4, %s1246_s23 }
  0xa0   : > { %563 = vrot.lane.b32.xlu1 %v274_v26, %s1303_s24 }
  0xa1   : > { %561 = vrot.lane.b32.xlu0 %v273_v27, %s1303_s24 }
  0xa4   : > { %1018 = vrot.lane.b32.xlu1 %v299_v16, %s1304_s27 }
  0xa5   : > { %1016 = vrot.lane.b32.xlu0 %v1367_v18, %s1304_s27 }
  0xa8   : > { %1014 = vrot.lane.b32.xlu1 %v1371_v22, %s1304_s27 }
  0xa9   : > { %559 = vrot.lane.b32.xlu0 %v272_v30, %s1303_s24 }
  0xad   : > { %1105 = vperm.xlu0 %1281, %v1102_v32  }
  0xfe   : > { %v747_v33 = vpop.permute.xlu1 %746 }
  0xff   : > { %v745_v34 = vpop.permute.xlu0 %744 }
 0x100   : > { %v749_v35 = vsel %vm565_vm11, %v745_v34, %v747_v33 }
 0x101   : > { %1227 = vmatprep.subr.msk.mxu0 %vm316_vm5, %v749_v35 }
 0x102   : > { %v743_v36 = vpop.permute.xlu1 %742 }
 0x103   : > { %v748_v38 = vsel %vm565_vm11, %v743_v36, %v745_v34  ;;  %v304_v39 = vpop.permute.xlu0 %303 }
 0x104   : > { %1228 = vmatpush1.msk.msra.mxu0 %vm316_vm5, %v748_v38  ;;  %v310_v41 = vsel %vm309_vm9, %v304_v39, %v306_v28 }
 0x105   : > { %1209 = vmatpush1.msk.msra.mxu1 %vm316_vm5, %v310_v41  ;;  %1229 = vmatmul.mubr.msk.f32.vlgmr.msra.gmra.mrb[0].mxu0 %vm312_vm8, %v1226_v37 }
 0x106   : > { %v837_v42 = vpop.permute.xlu1 %836  ;;  %1210 = vmatmul.mubr.msk.f32.vlgmr.msra.gmra.mrb[0].mxu1 %vm312_vm8, %v1207_v40  ;;  %1211 = vmatprep.subr.msk.mxu1 %vm316_vm5, %v273_v27 }
 0x107   : > { %v835_v43 = vpop.permute.xlu0 %834  ;;  %1212 = vmatpush1.msk.msra.mxu1 %vm316_vm5, %v272_v30  ;;  %465 = vmatprep.mubr.f32.mxu1 %v1302_v3 }
 0x108   : > { %v840_v44 = vsel %vm838_vm12, %v835_v43, %v837_v42  ;;  %1215 = vmatprep.subr.msk.mxu1 %vm316_vm5, %v1367_v18  ;;  %912 = vmatprep.mubr.f32.mxu0 %v1302_v3 }
 0x109   : > { %1231 = vmatprep.subr.msk.mxu0 %vm316_vm5, %v840_v44 }
 0x10a   : > { %v926_v45 = vpop.permute.xlu1 %925 }
 0x10b   : > { %v833_v46 = vpop.permute.xlu0 %832 }
 0x10c   : > { %v839_v49 = vsel %vm838_vm12, %v833_v46, %v835_v43 }
 0x10d   : > { %1232 = vmatpush1.msk.msra.mxu0 %vm316_vm5, %v839_v49 }
 0x10e   : > { %v924_v50 = vpop.permute.xlu1 %923  ;;  %1213 = vmatmul.mubr.msk.f32.vlgmr.msra.gmra.mrb[0].mxu1 %vm312_vm8, %v300_v47  ;;  %1233 = vmatmul.mubr.msk.f32.vlgmr.msra.gmra.mrb[0].mxu0 %vm312_vm8, %v1230_v48 }
 0x10f   : > { %1216 = vmatpush1.msk.msra.mxu1 %vm316_vm5, %v1371_v22  ;;  %v928_v51 = vpop.permute.xlu0 %927  ;;  %547 = vmatprep.mubr.f32.mxu1 %v1302_v3  ;;  %v930_v53 = vsel %vm929_vm13, %v924_v50, %v926_v45 }
 0x110   : > { %v931_v52 = vsel %vm929_vm13, %v926_v45, %v928_v51  ;;  %1003 = vmatprep.mubr.f32.mxu0 %v1302_v3 }
 0x111   : > { %1235 = vmatprep.subr.msk.mxu0 %vm316_vm5, %v931_v52 }
 0x112   : > { %v564_v54 = vpop.permute.xlu1 %563  ;;  %1236 = vmatpush1.msk.msra.mxu0 %vm316_vm5, %v930_v53 }
 0x113   : > { %v562_v55 = vpop.permute.xlu0 %561 }
 0x114   : > { %v567_v58 = vsel %vm565_vm11, %v562_v55, %v564_v54 }
 0x115   : > { %1219 = vmatprep.subr.msk.mxu1 %vm316_vm5, %v567_v58 }
 0x116   : > { %v1019_v59 = vpop.permute.xlu1 %1018  ;;  %1217 = vmatmul.mubr.msk.f32.vlgmr.msra.gmra.mrb[0].mxu1 %vm312_vm8, %v1214_v56  ;;  %1237 = vmatmul.mubr.msk.f32.vlgmr.msra.gmra.mrb[0].mxu0 %vm312_vm8, %v1234_v57 }
 0x117   : > { %v1017_v60 = vpop.permute.xlu0 %1016  ;;  %639 = vmatprep.mubr.f32.mxu1 %v1302_v3  ;;  %1093 = vmatprep.mubr.f32.mxu0 %v1302_v3 }
 0x118   : > { %v1021_v61 = vsel %vm838_vm12, %v1017_v60, %v1019_v59 }
 0x119   : > { %1239 = vmatprep.subr.msk.mxu0 %vm316_vm5, %v1021_v61 }
 0x11a   : > { %v1015_v62 = vpop.permute.xlu1 %1014 }
 0x11b   : > { %v1020_v63 = vsel %vm838_vm12, %v1015_v62, %v1017_v60  ;;  %v560_v0 = vpop.permute.xlu0 %559 }
 0x11c   : > { %v566_v4 = vsel %vm565_vm11, %v560_v0, %v562_v55  ;;  %1240 = vmatpush1.msk.msra.mxu0 %vm316_vm5, %v1020_v63 }
 0x11d   : > { %1220 = vmatpush1.msk.msra.mxu1 %vm316_vm5, %v566_v4 }
 0x11e   : > { %1221 = vmatmul.mubr.msk.f32.vlgmr.msra.gmra.mrb[0].mxu1 %vm312_vm8, %v1218_v1  ;;  %1241 = vmatmul.mubr.msk.f32.vlgmr.msra.gmra.mrb[0].mxu0 %vm312_vm8, %v1238_v2 }
 0x12c   : > { %v1106_v3 = vpop.permute.xlu0 %1105 }
 0x1f1   : > { %v641_v5 = vpop.f32.mrb[0].mxu1  ;;  %v1095_v6 = vpop.f32.mrb[0].mxu0 }
 0x1f2   : > { %v1248_v7 = vadd.f32 %v1095_v6, %v641_v5  ;;  %v643_v8 = vpop.f32.mrb[1].mxu1  ;;  %v1097_v9 = vpop.f32.mrb[1].mxu0 }
 0x1f3   : > { %v1249_v10 = vadd.f32 %v1097_v9, %v643_v8 }
 0x1f4   : > { %v1108_v13 = vadd.f32 %v1248_v7, %v1106_v3 }
 0x1f5   : > { %v1109_v14 = vadd.f32 %v1249_v10, %v1106_v3 }
 0x1f6   : > { %v1112_v15 = vadd.f32 %v1110_v11, %v1108_v13 }
 0x1f7   : > { %v1113_v16 = vadd.f32 %v1111_v12, %v1109_v14 }
 0x1f8   : > { %v1242_v17 = vmul.f32 -1.442695, %v1112_v15 }
 0x1f9   : > { %v1243_v18 = vmul.f32 -1.442695, %v1113_v16 }
 0x1fa   : > { %1283 = vpow2.f32 %v1242_v17 }
 0x1fb   : > { %1285 = vpow2.f32 %v1243_v18 }
 0x204   : > { %v1284_v19 = vpop.eup %1283 }
 0x205   : > { %v1286_v20 = vpop.eup %1285  ;;  %v1120_v21 = vadd.f32 1.0, %v1284_v19 }
 0x206   : > { %v1121_v22 = vadd.f32 1.0, %v1286_v20 }
 0x207   : > { %1287 = vrcp.f32 %v1120_v21 }
 0x208   : > { %1289 = vrcp.f32 %v1121_v22 }
 0x211   : > { %v1288_v23 = vpop.eup %1287 }
 0x212   : > { %v1290_v24 = vpop.eup %1289  ;;  %v1126_v25 = vmul.f32 %v1288_v23, %v1112_v15 }
 0x213   : > { %v1127_v26 = vmul.f32 %v1290_v24, %v1113_v16 }
 0x214   : > { %1128 = vst [vmem:[%s217_s28] sm:$0xff] %v1126_v25 }
 0x215   : > { %1129 = vst [vmem:[%s217_s28 + $0x8] sm:$0xff] %v1127_v26 }
 0x216 PF: > { %s14_s15 = sadd.s32 1, %s1297_s15  }
 0x217   : > { %p11_p4 = scmp.ge.s32.totalorder %s14_s15, 4  }
 0x219   :  { %13 = sbr.rel (!%p11_p4) target bundleno = 1 (0x1), region = 77 }

</bundles_post_ra>
